<compile_context>
chip_gen: v6e
topology: v6e:2x2x1
jax: 0.10.0
libtpu: 0.0.40
codegen_flags: <defaults>
</compile_context>

<pallas_src>
import functools

import jax
import jax.numpy as jnp
from jax.experimental import pallas as pl
from jax.experimental.pallas import tpu as pltpu

_INV_SQRT2 = 0.7071067811865476


def _round_up(v, m):
    return (v + m - 1) // m * m


def _pick_ff_tile(d_ff, requested):
    """Largest multiple of 128 that divides d_ff and is <= requested."""
    best = 0
    t = 128
    while t <= min(requested, d_ff):
        if d_ff % t == 0:
            best = t
        t += 128
    return best if best > 0 else d_ff  # fallback: whole d_ff per step


def _ffn_kernel(x_ref, w1_ref, b1_ref, w2_ref, b2_ref, gamma_ref, beta_ref,
                o_ref, acc_ref, *, eps):
    """Grid = (row tiles, d_ff tiles).  acc_ref: (tm, d_model) f32 scratch."""
    k = pl.program_id(1)

    @pl.when(k == 0)
    def _init():
        acc_ref[...] = jnp.zeros_like(acc_ref)

    # ---- w_1 block: (tm, d_model) @ (d_model, tf) on the MXU, f32 accum ----
    h = jnp.dot(x_ref[...], w1_ref[...], preferred_element_type=jnp.float32)
    h = h + b1_ref[...].astype(jnp.float32)

    # Exact GELU (PyTorch nn.GELU default): 0.5*x*(1 + erf(x/sqrt(2))), in f32
    # (erf runs on the EUP -> separate issue slot from the MXU/VPU).
    h = 0.5 * h * (1.0 + jax.lax.erf(h * _INV_SQRT2))

    # TODO(synk): dropout omitted (eval-mode identity).

    # ---- accumulate w_2 block: (tm, tf) @ (tf, d_model), f32 accumulator ----
    acc_ref[...] += jnp.dot(h.astype(w2_ref.dtype), w2_ref[...],
                            preferred_element_type=jnp.float32)

    # ---- finalize: bias + residual + LayerNorm, once per row tile ----
    @pl.when(k == pl.num_programs(1) - 1)
    def _finalize():
        xf = x_ref[...].astype(jnp.float32)
        y = acc_ref[...] + b2_ref[...].astype(jnp.float32) + xf
        mean = jnp.mean(y, axis=-1, keepdims=True)
        var = jnp.mean((y - mean) * (y - mean), axis=-1, keepdims=True)
        y_hat = (y - mean) * jax.lax.rsqrt(var + jnp.float32(eps))
        out = (y_hat * gamma_ref[...].astype(jnp.float32)
               + beta_ref[...].astype(jnp.float32))
        o_ref[...] = out.astype(o_ref.dtype)


def positionwise_ffn(x, w1, b1, w2, b2, gamma, beta, *,
                     eps=1e-5, tm=512, tf=512):
    """x: (B, S, d_model) -> (B, S, d_model).

    w1: (d_model, d_ff), w2: (d_ff, d_model)  (transposed PyTorch Linear
    weights); b1: (d_ff,), b2/gamma/beta: (d_model,).
    """
    B, S, d_model = x.shape
    d_ff = w1.shape[1]
    rows = B * S

    # Row tile: as large as requested but no larger than the (padded) row
    # count; keep it a multiple of 16 sublanes (valid for f32 and bf16).
    tm = min(tm, _round_up(rows, 16))
    rows_p = _round_up(rows, tm)

    # d_ff tile: stream weights block-by-block along the reduction axis.
    tf = _pick_ff_tile(d_ff, tf)

    x2 = x.reshape(rows, d_model)
    if rows_p != rows:
        x2 = jnp.pad(x2, ((0, rows_p - rows), (0, 0)))

    b1_2 = b1.reshape(1, d_ff)
    b2_2 = b2.reshape(1, d_model)
    g_2 = gamma.reshape(1, d_model)
    be_2 = beta.reshape(1, d_model)

    grid = (rows_p // tm, d_ff // tf)

    def _nbytes(a):
        return a.size * a.dtype.itemsize

    cost = pl.CostEstimate(
        flops=4 * rows_p * d_model * d_ff,          # two matmuls
        transcendentals=rows_p * d_ff,              # erf in GELU
        bytes_accessed=(2 * _nbytes(x2)
                        + grid[0] * (_nbytes(w1) + _nbytes(w2))  # re-streamed
                        + _nbytes(b1) + _nbytes(b2)
                        + _nbytes(gamma) + _nbytes(beta)),
    )

    out = pl.pallas_call(
        functools.partial(_ffn_kernel, eps=eps),
        out_shape=jax.ShapeDtypeStruct((rows_p, d_model), x.dtype),
        grid_spec=pltpu.PrefetchScalarGridSpec(
            num_scalar_prefetch=0,
            grid=grid,
            in_specs=[
                pl.BlockSpec((tm, d_model), lambda i, k: (i, 0)),    # x rows
                pl.BlockSpec((d_model, tf), lambda i, k: (0, k)),    # w1 block
                pl.BlockSpec((1, tf), lambda i, k: (0, k)),          # b1 block
                pl.BlockSpec((tf, d_model), lambda i, k: (k, 0)),    # w2 block
                pl.BlockSpec((1, d_model), lambda i, k: (0, 0)),     # b2
                pl.BlockSpec((1, d_model), lambda i, k: (0, 0)),     # gamma
                pl.BlockSpec((1, d_model), lambda i, k: (0, 0)),     # beta
            ],
            out_specs=pl.BlockSpec((tm, d_model), lambda i, k: (i, 0)),
            scratch_shapes=[pltpu.VMEM((tm, d_model), jnp.float32)],
        ),
        compiler_params=pltpu.CompilerParams(
            dimension_semantics=("parallel", "arbitrary"),
            vmem_limit_bytes=64 * 1024 * 1024,
        ),
        cost_estimate=cost,
    )(x2, w1, b1_2, w2, b2_2, g_2, be_2)

    if rows_p != rows:
        out = out[:rows]
    return out.reshape(B, S, d_model)


def _reference(x, w1, b1, w2, b2, gamma, beta, eps=1e-5):
    """Pure-JAX reference mirroring the kernel's mixed-precision path."""
    xf = x.astype(jnp.float32)
    h = jnp.dot(xf, w1.astype(jnp.float32)) + b1
    h = 0.5 * h * (1.0 + jax.lax.erf(h * _INV_SQRT2))
    h = h.astype(w2.dtype).astype(jnp.float32)   # kernel casts h to w2 dtype
    y = jnp.dot(h, w2.astype(jnp.float32)) + b2 + xf
    mean = jnp.mean(y, axis=-1, keepdims=True)
    var = jnp.mean((y - mean) ** 2, axis=-1, keepdims=True)
    return (y - mean) * jax.lax.rsqrt(var + eps) * gamma + beta


if __name__ == "__main__":
    key = jax.random.PRNGKey(0)
    B, S, d_model, d_ff = 2, 8, 128, 256   # lane-aligned (d_model % 128 == 0)

    k_x, k_w1, k_b1, k_w2, k_b2 = jax.random.split(key, 5)
    x = jax.random.normal(k_x, (B, S, d_model), dtype=jnp.float32)

    lim1 = 1.0 / float(jnp.sqrt(jnp.float32(d_model)))
    lim2 = 1.0 / float(jnp.sqrt(jnp.float32(d_ff)))
    w1 = jax.random.uniform(k_w1, (d_model, d_ff), jnp.float32, -lim1, lim1)
    b1 = jax.random.uniform(k_b1, (d_ff,), jnp.float32, -lim1, lim1)
    w2 = jax.random.uniform(k_w2, (d_ff, d_model), jnp.float32, -lim2, lim2)
    b2 = jax.random.uniform(k_b2, (d_model,), jnp.float32, -lim2, lim2)
    gamma = jnp.ones((d_model,), jnp.float32)
    beta = jnp.zeros((d_model,), jnp.float32)

    # Feed bf16 activations / weights straight to the MXU (f32 accumulation
    # inside the kernel); bias / LayerNorm parameters stay f32.
    x_bf = x.astype(jnp.bfloat16)
    w1_bf = w1.astype(jnp.bfloat16)
    w2_bf = w2.astype(jnp.bfloat16)

    out = positionwise_ffn(x_bf, w1_bf, b1, w2_bf, b2, gamma, beta)
    out = jax.block_until_ready(out)

    ref = _reference(x_bf, w1_bf, b1, w2_bf, b2, gamma, beta)
    assert out.shape == (B, S, d_model)
    max_err = float(jnp.max(jnp.abs(out.astype(jnp.float32) - ref)))
    assert max_err < 3e-2, f"mismatch vs reference: max abs err {max_err}"

    print("KERNEL_OK")
</pallas_src>

<mosaic_0001>
module attributes {stable_mosaic.version = 11 : i64} {
  func.func @_ffn_kernel(%arg0: i32, %arg1: i32, %arg2: memref<16x128xbf16, #tpu.memory_space<vmem>>, %arg3: memref<128x256xbf16, #tpu.memory_space<vmem>>, %arg4: memref<1x256xf32, #tpu.memory_space<vmem>>, %arg5: memref<256x128xbf16, #tpu.memory_space<vmem>>, %arg6: memref<1x128xf32, #tpu.memory_space<vmem>>, %arg7: memref<1x128xf32, #tpu.memory_space<vmem>>, %arg8: memref<1x128xf32, #tpu.memory_space<vmem>>, %arg9: memref<16x128xbf16, #tpu.memory_space<vmem>>, %arg10: memref<16x128xf32, #tpu.memory_space<vmem>>) attributes {dimension_semantics = [#tpu.dimension_semantics<parallel>, #tpu.dimension_semantics<arbitrary>], iteration_bounds = array<i64: 1, 1>, scalar_prefetch = 0 : i64, scratch_operands = 1 : i64, tpu.core_type = #tpu.core_type<tc>, window_params = [{transform_indices = @transform_0, window_bounds = array<i64: 16, 128>}, {transform_indices = @transform_1, window_bounds = array<i64: 128, 256>}, {transform_indices = @transform_2, window_bounds = array<i64: 1, 256>}, {transform_indices = @transform_3, window_bounds = array<i64: 256, 128>}, {pipeline_mode = #tpu.pipeline_mode<synchronous>, transform_indices = @transform_4, window_bounds = array<i64: 1, 128>}, {pipeline_mode = #tpu.pipeline_mode<synchronous>, transform_indices = @transform_5, window_bounds = array<i64: 1, 128>}, {pipeline_mode = #tpu.pipeline_mode<synchronous>, transform_indices = @transform_6, window_bounds = array<i64: 1, 128>}, {transform_indices = @transform_7, window_bounds = array<i64: 16, 128>}]} {
    %c0_i32 = arith.constant 0 : i32
    %0 = arith.cmpi eq, %arg1, %c0_i32 : i32
    %1 = arith.extui %0 : i1 to i32
    %c0_i32_0 = arith.constant 0 : i32
    %2 = arith.cmpi ne, %1, %c0_i32_0 : i32
    scf.if %2 {
      %cst_18 = arith.constant 0.000000e+00 : f32
      %26 = vector.broadcast %cst_18 : f32 to vector<16x128xf32>
      %c0_19 = arith.constant 0 : index
      %c0_20 = arith.constant 0 : index
      %27 = vector.load %arg10[%c0_19, %c0_20] : memref<16x128xf32, #tpu.memory_space<vmem>>, vector<16x128xf32>
      tpu.vector_store %arg10[%c0_19, %c0_20], %26 {strides = array<i32>} : memref<16x128xf32, #tpu.memory_space<vmem>>, vector<16x128xf32>,
    } else {
    }
    %c0 = arith.constant 0 : index
    %c0_1 = arith.constant 0 : index
    %3 = vector.load %arg2[%c0, %c0_1] : memref<16x128xbf16, #tpu.memory_space<vmem>>, vector<16x128xbf16>
    %c0_2 = arith.constant 0 : index
    %c0_3 = arith.constant 0 : index
    %4 = vector.load %arg3[%c0_2, %c0_3] : memref<128x256xbf16, #tpu.memory_space<vmem>>, vector<128x256xbf16>
    %cst = arith.constant dense<0.000000e+00> : vector<16x256xf32>
    %5 = tpu.matmul %3, %4, %cst {dimension_numbers = #tpu.dot_dimension_numbers<[1], [0], [0], [1], [0, 0, 1, 1], [], []>} : vector<16x128xbf16>, vector<128x256xbf16>, vector<16x256xf32> -> vector<16x256xf32>
    %c0_4 = arith.constant 0 : index
    %c0_5 = arith.constant 0 : index
    %6 = vector.load %arg4[%c0_4, %c0_5] : memref<1x256xf32, #tpu.memory_space<vmem>>, vector<1x256xf32>
    %7 = vector.broadcast %6 : vector<1x256xf32> to vector<16x256xf32>
    %8 = arith.addf %5, %7 : vector<16x256xf32>
    %cst_6 = arith.constant 5.000000e-01 : f32
    %9 = vector.broadcast %cst_6 : f32 to vector<16x256xf32>
    %10 = arith.mulf %9, %8 : vector<16x256xf32>
    %cst_7 = arith.constant 0.707106769 : f32
    %11 = vector.broadcast %cst_7 : f32 to vector<16x256xf32>
    %12 = arith.mulf %8, %11 : vector<16x256xf32>
    %13 = math.erf %12 : vector<16x256xf32>
    %cst_8 = arith.constant 1.000000e+00 : f32
    %14 = vector.broadcast %cst_8 : f32 to vector<16x256xf32>
    %15 = arith.addf %14, %13 : vector<16x256xf32>
    %16 = arith.mulf %10, %15 : vector<16x256xf32>
    %c0_9 = arith.constant 0 : index
    %c0_10 = arith.constant 0 : index
    %17 = vector.load %arg10[%c0_9, %c0_10] : memref<16x128xf32, #tpu.memory_space<vmem>>, vector<16x128xf32>
    %18 = arith.truncf %16 : vector<16x256xf32> to vector<16x256xbf16>
    %c0_11 = arith.constant 0 : index
    %c0_12 = arith.constant 0 : index
    %19 = vector.load %arg5[%c0_11, %c0_12] : memref<256x128xbf16, #tpu.memory_space<vmem>>, vector<256x128xbf16>
    %cst_13 = arith.constant dense<0.000000e+00> : vector<16x128xf32>
    %20 = tpu.matmul %18, %19, %cst_13 {dimension_numbers = #tpu.dot_dimension_numbers<[1], [0], [0], [1], [0, 0, 1, 1], [], []>} : vector<16x256xbf16>, vector<256x128xbf16>, vector<16x128xf32> -> vector<16x128xf32>
    %21 = arith.addf %17, %20 : vector<16x128xf32>
    %c0_14 = arith.constant 0 : index
    %c0_15 = arith.constant 0 : index
    %22 = vector.load %arg10[%c0_14, %c0_15] : memref<16x128xf32, #tpu.memory_space<vmem>>, vector<16x128xf32>
    tpu.vector_store %arg10[%c0_14, %c0_15], %21 {strides = array<i32>} : memref<16x128xf32, #tpu.memory_space<vmem>>, vector<16x128xf32>,
    %c0_i32_16 = arith.constant 0 : i32
    %23 = arith.cmpi eq, %arg1, %c0_i32_16 : i32
    %24 = arith.extui %23 : i1 to i32
    %c0_i32_17 = arith.constant 0 : i32
    %25 = arith.cmpi ne, %24, %c0_i32_17 : i32
    scf.if %25 {
      %c0_18 = arith.constant 0 : index
      %c0_19 = arith.constant 0 : index
      %26 = vector.load %arg2[%c0_18, %c0_19] : memref<16x128xbf16, #tpu.memory_space<vmem>>, vector<16x128xbf16>
      %27 = arith.extf %26 : vector<16x128xbf16> to vector<16x128xf32>
      %c0_20 = arith.constant 0 : index
      %c0_21 = arith.constant 0 : index
      %28 = vector.load %arg10[%c0_20, %c0_21] : memref<16x128xf32, #tpu.memory_space<vmem>>, vector<16x128xf32>
      %c0_22 = arith.constant 0 : index
      %c0_23 = arith.constant 0 : index
      %29 = vector.load %arg6[%c0_22, %c0_23] : memref<1x128xf32, #tpu.memory_space<vmem>>, vector<1x128xf32>
      %30 = vector.broadcast %29 : vector<1x128xf32> to vector<16x128xf32>
      %31 = arith.addf %28, %30 : vector<16x128xf32>
      %32 = arith.addf %31, %27 : vector<16x128xf32>
      %cst_24 = arith.constant dense<0.000000e+00> : vector<16xf32>
      %33 = vector.multi_reduction <add>, %32, %cst_24 [1] : vector<16x128xf32> to vector<16xf32>
      %34 = vector.shape_cast %33 : vector<16xf32> to vector<16x1xf32>
      %cst_25 = arith.constant 1.280000e+02 : f32
      %35 = vector.broadcast %cst_25 : f32 to vector<16x1xf32>
      %36 = arith.divf %34, %35 : vector<16x1xf32>
      %37 = vector.broadcast %36 : vector<16x1xf32> to vector<16x128xf32>
      %38 = arith.subf %32, %37 : vector<16x128xf32>
      %39 = vector.broadcast %36 : vector<16x1xf32> to vector<16x128xf32>
      %40 = arith.subf %32, %39 : vector<16x128xf32>
      %41 = arith.mulf %38, %40 : vector<16x128xf32>
      %cst_26 = arith.constant dense<0.000000e+00> : vector<16xf32>
      %42 = vector.multi_reduction <add>, %41, %cst_26 [1] : vector<16x128xf32> to vector<16xf32>
      %43 = vector.shape_cast %42 : vector<16xf32> to vector<16x1xf32>
      %cst_27 = arith.constant 1.280000e+02 : f32
      %44 = vector.broadcast %cst_27 : f32 to vector<16x1xf32>
      %45 = arith.divf %43, %44 : vector<16x1xf32>
      %46 = vector.broadcast %36 : vector<16x1xf32> to vector<16x128xf32>
      %47 = arith.subf %32, %46 : vector<16x128xf32>
      %cst_28 = arith.constant 9.99999974E-6 : f32
      %48 = vector.broadcast %cst_28 : f32 to vector<16x1xf32>
      %49 = arith.addf %45, %48 : vector<16x1xf32>
      %50 = math.rsqrt %49 : vector<16x1xf32>
      %51 = vector.broadcast %50 : vector<16x1xf32> to vector<16x128xf32>
      %52 = arith.mulf %47, %51 : vector<16x128xf32>
      %c0_29 = arith.constant 0 : index
      %c0_30 = arith.constant 0 : index
      %53 = vector.load %arg7[%c0_29, %c0_30] : memref<1x128xf32, #tpu.memory_space<vmem>>, vector<1x128xf32>
      %54 = vector.broadcast %53 : vector<1x128xf32> to vector<16x128xf32>
      %55 = arith.mulf %52, %54 : vector<16x128xf32>
      %c0_31 = arith.constant 0 : index
      %c0_32 = arith.constant 0 : index
      %56 = vector.load %arg8[%c0_31, %c0_32] : memref<1x128xf32, #tpu.memory_space<vmem>>, vector<1x128xf32>
      %57 = vector.broadcast %56 : vector<1x128xf32> to vector<16x128xf32>
      %58 = arith.addf %55, %57 : vector<16x128xf32>
      %59 = arith.truncf %58 : vector<16x128xf32> to vector<16x128xbf16>
      %c0_33 = arith.constant 0 : index
      %c0_34 = arith.constant 0 : index
      %60 = vector.load %arg9[%c0_33, %c0_34] : memref<16x128xbf16, #tpu.memory_space<vmem>>, vector<16x128xbf16>
      tpu.vector_store %arg9[%c0_33, %c0_34], %59 {strides = array<i32>} : memref<16x128xbf16, #tpu.memory_space<vmem>>, vector<16x128xbf16>,
    } else {
    }
    return
  }
  func.func @transform_0(%arg0: i32, %arg1: i32) -> (i32, i32) {
    %c0_i32 = arith.constant 0 : i32
    %c0_i32_0 = arith.constant 0 : i32
    return %arg0, %c0_i32 : i32, i32
  }
  func.func @transform_1(%arg0: i32, %arg1: i32) -> (i32, i32) {
    %c0_i32 = arith.constant 0 : i32
    %c0_i32_0 = arith.constant 0 : i32
    return %c0_i32, %arg1 : i32, i32
  }
  func.func @transform_2(%arg0: i32, %arg1: i32) -> (i32, i32) {
    %c0_i32 = arith.constant 0 : i32
    %c0_i32_0 = arith.constant 0 : i32
    return %c0_i32, %arg1 : i32, i32
  }
  func.func @transform_3(%arg0: i32, %arg1: i32) -> (i32, i32) {
    %c0_i32 = arith.constant 0 : i32
    %c0_i32_0 = arith.constant 0 : i32
    return %arg1, %c0_i32 : i32, i32
  }
  func.func @transform_4(%arg0: i32, %arg1: i32) -> (i32, i32) {
    %c0_i32 = arith.constant 0 : i32
    %c0_i32_0 = arith.constant 0 : i32
    %c0_i32_1 = arith.constant 0 : i32
    return %c0_i32, %c0_i32_0 : i32, i32
  }
  func.func @transform_5(%arg0: i32, %arg1: i32) -> (i32, i32) {
    %c0_i32 = arith.constant 0 : i32
    %c0_i32_0 = arith.constant 0 : i32
    %c0_i32_1 = arith.constant 0 : i32
    return %c0_i32, %c0_i32_0 : i32, i32
  }
  func.func @transform_6(%arg0: i32, %arg1: i32) -> (i32, i32) {
    %c0_i32 = arith.constant 0 : i32
    %c0_i32_0 = arith.constant 0 : i32
    %c0_i32_1 = arith.constant 0 : i32
    return %c0_i32, %c0_i32_0 : i32, i32
  }
  func.func @transform_7(%arg0: i32, %arg1: i32) -> (i32, i32) {
    %c0_i32 = arith.constant 0 : i32
    %c0_i32_0 = arith.constant 0 : i32
    return %arg0, %c0_i32 : i32, i32
  }
}

</mosaic_0001>

<bundles_post_ra>
// kernel: tpu_custom_call.1
= control target key start
LH: loop header
LB: loop body
LE: loop exit
PB: predicated region body
PF: predicated region fallthrough
CT: control target
= control target key end

     0   :  { %12 = vsyncpa [#allocation4], 0  ;;  %s821_s0 = inlined_call_operand.hbm [shape: bf16[16,128], index: 0, kind: input, shape index: {}]   ;;  %s822_s1 = inlined_call_operand.hbm [shape: bf16[128,256], index: 1, kind: input, shape index: {}]   ;;  %s823_s2 = inlined_call_operand.vmem [shape: f32[1,256], index: 2, kind: input, shape index: {}]   ;;  %s824_s3 = inlined_call_operand.hbm [shape: bf16[256,128], index: 3, kind: input, shape index: {}]   ;;  %s825_s4 = inlined_call_operand.vmem [shape: f32[1,128], index: 4, kind: input, shape index: {}]   ;;  %s826_s5 = inlined_call_operand.vmem [shape: f32[1,128], index: 5, kind: input, shape index: {}]   ;;  %s827_s6 = inlined_call_operand.vmem [shape: f32[1,128], index: 6, kind: input, shape index: {}]   ;;  %s828_s7 = inlined_call_operand.hbm [shape: bf16[16,128], index: 7, kind: output, shape index: {}]  }
   0x1   :  { %13 = vsyncpa [#allocation7], 0 }
   0x2   :  { %14 = vsyncpa [#allocation5], 0  ;;  %s739_s24 = smov [#allocation6]  }
   0x3   :  { %s32_s25 = sshll.u32 %s739_s24, 4  ;;  %s33_s25 = int_to_ptr.vmem [resolvable:$true] %s32_s25 }
   0x4   :  { %s661_s26 = scalar_lea.vmem %s33_s25, 2048  ;;  %p666_p1 = scmp.lt.s32.totalorder %s33_s25, %s33_s25 }
   0x5   :  { %p662_p0 = scmp.ne.s32.totalorder %s33_s25, %s661_s26  ;;  %p667_p2 = scmp.lt.s32.totalorder %s661_s26, %s661_s26 }
   0x7   :  { %p668_p3 = por %p667_p2, %p666_p1 }
   0x9   :  { %p669_p4 = pnand %p668_p3, %p662_p0 }
   0xb   :  { %672 = shalt.err (!%p669_p4)
}
   0xc   :  { %s740_s27 = smov 128   ;;  %s741_s28 = smov 8  }
   0xd   :  { %38 = dma.hbm_to_vmem [thread:$0]  %s822_s1, 2048, %s33_s25, [#allocation7], %s740_s27, %s740_s27, %s741_s28  }
   0xe   :  { %s742_s8 = smov [#allocation3]  }
   0xf   :  { %s20_s9 = sshll.u32 %s742_s8, 4  ;;  %s21_s9 = int_to_ptr.vmem [resolvable:$true] %s20_s9 }
  0x10   :  { %s681_s10 = scalar_lea.vmem %s21_s9, 128  ;;  %p686_p6 = scmp.lt.s32.totalorder %s21_s9, %s21_s9 }
  0x11   :  { %p682_p5 = scmp.ne.s32.totalorder %s21_s9, %s681_s10  ;;  %p687_p7 = scmp.lt.s32.totalorder %s681_s10, %s681_s10 }
  0x13   :  { %p688_p8 = por %p687_p7, %p686_p6 }
  0x15   :  { %p689_p9 = pnand %p688_p8, %p682_p5 }
  0x17   :  { %692 = shalt.err (!%p689_p9)
}
  0x18   :  { %s743_s11 = smov 64   ;;  %s744_s12 = smov 4  }
  0x19   :  { %26 = dma.hbm_to_vmem [thread:$0]  %s821_s0, 128, %s21_s9, [#allocation4], %s743_s11, %s743_s11, %s744_s12  }
  0x1a   :  { %s745_s1 = smov [#allocation8]  }
  0x1b   :  { %s46_s15 = sshll.u32 %s745_s1, 4  ;;  %s47_s15 = int_to_ptr.vmem [resolvable:$true] %s46_s15 }
  0x1c   :  { %s701_s16 = scalar_lea.vmem %s47_s15, 2048  ;;  %p706_p11 = scmp.lt.s32.totalorder %s47_s15, %s47_s15 }
  0x1d   :  { %p702_p10 = scmp.ne.s32.totalorder %s47_s15, %s701_s16  ;;  %p707_p12 = scmp.lt.s32.totalorder %s701_s16, %s701_s16 }
  0x1f   :  { %p708_p13 = por %p707_p12, %p706_p11 }
  0x21   :  { %p709_p0 = pnand %p708_p13, %p702_p10 }
  0x23   :  { %712 = shalt.err (!%p709_p0)
}
  0x24   :  { %52 = dma.hbm_to_vmem [thread:$0]  %s824_s3, 2048, %s47_s15, [#allocation7], %s743_s11, %s743_s11, %s744_s12  }
  0x25   :  { %733 = dma.done.wait [#allocation4], 128  }
  0x26   :  { %734 = vsyncadd [#allocation4], 4294967168 }
  0x27   :  { %735 = dma.done.wait [#allocation7], 4096  }
  0x28   :  { %736 = vsyncadd [#allocation7], 4294963200  ;;  %v746_v0 = vmov 0   ;;  %v600_v1 = vld [vmem:[#allocation6 + $0x74] ss:$8 sps:$4 sm:$0xff]   ;;  %v629_v22 = vld [vmem:[#allocation8 + $0x68] sm:$0xff]   ;;  %v95_v34 = vlaneseq }
  0x29   :  { %223 = vmatprep.mubr.bf16.mxu0 %v746_v0  ;;  %v602_v2 = vld [vmem:[#allocation6 + $0x70] ss:$8 sps:$4 sm:$0xff]   ;;  %191 = vmatprep.subr.bf16.mxu0 %v600_v1  ;;  %v603_v3 = vld [vmem:[#allocation6 + $0x64] ss:$8 sps:$4 sm:$0xff]   ;;  %v605_v4 = vld [vmem:[#allocation6 + $0x60] ss:$8 sps:$4 sm:$0xff]  }
  0x2a   :  { %192 = vmatpush1.bf16.msra.mxu0 %v602_v2  ;;  %v606_v5 = vld [vmem:[#allocation6 + $0x54] ss:$8 sps:$4 sm:$0xff]   ;;  %v608_v6 = vld [vmem:[#allocation6 + $0x50] ss:$8 sps:$4 sm:$0xff]   ;;  %v609_v7 = vld [vmem:[#allocation6 + $0x44] ss:$8 sps:$4 sm:$0xff]  }
  0x2b   :  { %193 = vmatprep.subr.bf16.mxu0 %v603_v3  ;;  %v611_v8 = vld [vmem:[#allocation6 + $0x40] ss:$8 sps:$4 sm:$0xff]   ;;  %v612_v9 = vld [vmem:[#allocation6 + $0x34] ss:$8 sps:$4 sm:$0xff]   ;;  %v614_v10 = vld [vmem:[#allocation6 + $0x30] ss:$8 sps:$4 sm:$0xff]  }
  0x2c   :  { %v615_v11 = vld [vmem:[#allocation6 + $0x24] ss:$8 sps:$4 sm:$0xff]   ;;  %v617_v12 = vld [vmem:[#allocation6 + $0x20] ss:$8 sps:$4 sm:$0xff]   ;;  %v618_v13 = vld [vmem:[#allocation6 + $0x14] ss:$8 sps:$4 sm:$0xff]  }
  0x2d   :  { %v620_v14 = vld [vmem:[#allocation6 + $0x10] ss:$8 sps:$4 sm:$0xff]   ;;  %v621_v15 = vld [vmem:[#allocation6 + $0x4] ss:$8 sps:$4 sm:$0xff]   ;;  %v623_v16 = vld [vmem:[#allocation6] ss:$8 sps:$4 sm:$0xff]  }
  0x2e   :  { %194 = vmatpush1.bf16.msra.mxu0 %v605_v4  ;;  %v624_v17 = vld [vmem:[#allocation3] sm:$0xff]   ;;  %v627_v20 = vld [vmem:[#allocation8 + $0x70] sm:$0xff]   ;;  %v630_v23 = vld [vmem:[#allocation8 + $0x28] sm:$0xff]   ;;  %v96_v35 = vshrl.u32 %v95_v34, 7  ;;  %s747_s23 = smov [#allocation9]  }
  0x2f   :  { %195 = vmatprep.subr.bf16.mxu0 %v606_v5  ;;  %v625_v18 = vld [vmem:[#allocation8 + $0x78] sm:$0xff]   ;;  %v628_v21 = vld [vmem:[#allocation8 + $0x30] sm:$0xff]   ;;  %v631_v24 = vld [vmem:[#allocation8 + $0x60] sm:$0xff]   ;;  %s507_s24 = sshll.u32 %s747_s23, 4  ;;  %s508_s24 = int_to_ptr.vmem [resolvable:$true] %s507_s24 }
  0x30   :  { %v626_v19 = vld [vmem:[#allocation8 + $0x38] sm:$0xff]   ;;  %569 = vmatprep.subr.bf16.mxu1 %v625_v18  ;;  %v632_v25 = vld [vmem:[#allocation8 + $0x20] sm:$0xff]   ;;  %v635_v28 = vld [vmem:[#allocation8 + $0x50] sm:$0xff]   ;;  %v97_v36 = vsub.s32 0, %v96_v35  ;;  %v101_v38 = vsub.s32 1, %v96_v35  ;;  %s713_s25 = scalar_lea.vmem %s508_s24, 128  ;;  %p718_p2 = scmp.lt.s32.totalorder %s508_s24, %s508_s24 }
  0x31   :  { %570 = vmatpush3.bf16.msra.mxu1 %v626_v19  ;;  %v633_v26 = vld [vmem:[#allocation8 + $0x58] sm:$0xff]   ;;  %v636_v29 = vld [vmem:[#allocation8 + $0x10] sm:$0xff]   ;;  %v637_v30 = vld [vmem:[#allocation8 + $0x48] sm:$0xff]   ;;  %p714_p1 = scmp.ne.s32.totalorder %s508_s24, %s713_s25  ;;  %p719_p3 = scmp.lt.s32.totalorder %s713_s25, %s713_s25 }
  0x32   :  { %196 = vmatpush1.bf16.msra.mxu0 %v608_v6  ;;  %571 = vmatprep.subr.bf16.mxu1 %v627_v20  ;;  %v634_v27 = vld [vmem:[#allocation8 + $0x18] sm:$0xff]   ;;  %v638_v31 = vld [vmem:[#allocation8 + $0x8] sm:$0xff]   ;;  %v639_v32 = vld [vmem:[#allocation8 + $0x40] sm:$0xff]  }
  0x33   :  { %197 = vmatprep.subr.bf16.mxu0 %v609_v7  ;;  %v640_v33 = vld [vmem:[#allocation8] sm:$0xff]   ;;  %v93_v37 = vld [vmem:[%s823_s2] sm:$0x3]  ;;  %p720_p4 = por %p719_p3, %p718_p2 }
  0x34   :  { %v98_v39 = vrot.slane %v93_v37, %v97_v36  ;;  %v102_v40 = vrot.slane %v93_v37, %v101_v38  ;;  %v554_v37 = vld [vmem:[%s826_s5] ss:$0 sm:$0xff] }
  0x35   :  { %572 = vmatpush3.bf16.msra.mxu1 %v628_v21  ;;  %p721_p5 = pnand %p720_p4, %p714_p1 }
  0x36   :  { %198 = vmatpush1.bf16.msra.mxu0 %v611_v8  ;;  %573 = vmatprep.subr.bf16.mxu1 %v629_v22  ;;  %v561_v8 = vld [vmem:[#allocation3] sm:$0xff]  }
  0x37   :  { %199 = vmatprep.subr.bf16.mxu0 %v612_v9  ;;  %v563_v18 = vunpack.c.h.bf16 %v561_v8 }
  0x39   :  { %574 = vmatpush3.bf16.msra.mxu1 %v630_v23 }
  0x3a   :  { %200 = vmatpush1.bf16.msra.mxu0 %v614_v10  ;;  %575 = vmatprep.subr.bf16.mxu1 %v631_v24  ;;  %v553_v10 = vld [vmem:[%s825_s4] ss:$0 sm:$0xff] }
  0x3b   :  { %201 = vmatprep.subr.bf16.mxu0 %v615_v11 }
  0x3d   :  { %576 = vmatpush3.bf16.msra.mxu1 %v632_v25 }
  0x3e   :  { %202 = vmatpush1.bf16.msra.mxu0 %v617_v12  ;;  %577 = vmatprep.subr.bf16.mxu1 %v633_v26  ;;  %v562_v12 = vunpack.c.l.bf16 %v561_v8 }
  0x3f   :  { %203 = vmatprep.subr.bf16.mxu0 %v618_v13 }
  0x41   :  { %578 = vmatpush3.bf16.msra.mxu1 %v634_v27 }
  0x42   :  { %204 = vmatpush1.bf16.msra.mxu0 %v620_v14  ;;  %579 = vmatprep.subr.bf16.mxu1 %v635_v28 }
  0x43   :  { %205 = vmatprep.subr.bf16.mxu0 %v621_v15 }
  0x45   :  { %580 = vmatpush3.bf16.msra.mxu1 %v636_v29 }
  0x46   :  { %206 = vmatpush1.bf16.msra.mxu0 %v623_v16  ;;  %581 = vmatprep.subr.bf16.mxu1 %v637_v30 }
  0x49   :  { %224 = vmatmul.mubr.bf16.vlgmr.msra.gmra.mxu0 %v624_v17  ;;  %582 = vmatpush3.bf16.msra.mxu1 %v638_v31 }
  0x4a   :  { %583 = vmatprep.subr.bf16.mxu1 %v639_v32 }
  0x4d   :  { %584 = vmatpush3.bf16.msra.mxu1 %v640_v33 }
 0x109   :  { %v225_v41 = vpop.f32.mrf.mxu0 }
 0x10a   :  { %v226_v42 = vadd.f32 %v225_v41, %v98_v39  ;;  %v555_v41 = vld [vmem:[%s827_s6] ss:$0 sm:$0xff] }
 0x10b   :  { %v227_v43 = vpop.f32.mrf.mxu0 }
 0x10c   :  { %v228_v44 = vadd.f32 %v227_v43, %v102_v40  ;;  %v238_v45 = vmul.f32 0.70710677, %v226_v42  ;;  %v234_v0 = vmul.f32 0.5, %v226_v42 }
 0x10d   :  { %v229_v46 = vpop.f32.mrf.mxu0 }
 0x10e   :  { %v239_v47 = vmul.f32 0.70710677, %v228_v44  ;;  %v230_v48 = vadd.f32 %v229_v46, %v98_v39  ;;  %v235_v61 = vmul.f32 0.5, %v228_v44 }
 0x10f   :  { %v231_v49 = vpop.f32.mrf.mxu0 }
 0x110   :  { %641 = verf.f32 %v239_v47  ;;  %v240_v50 = vmul.f32 0.70710677, %v230_v48  ;;  %v232_v51 = vadd.f32 %v231_v49, %v102_v40  ;;  %v236_v60 = vmul.f32 0.5, %v230_v48 }
 0x111   :  { %643 = verf.f32 %v238_v45 }
 0x112   :  { %645 = verf.f32 %v240_v50  ;;  %v241_v52 = vmul.f32 0.70710677, %v232_v51  ;;  %v237_v62 = vmul.f32 0.5, %v232_v51 }
 0x114   :  { %647 = verf.f32 %v241_v52 }
 0x11d   :  { %v642_v53 = vpop.eup %641 }
 0x11e   :  { %v644_v54 = vpop.eup %643  ;;  %v247_v57 = vadd.f32 1.0, %v642_v53 }
 0x11f   :  { %v646_v55 = vpop.eup %645  ;;  %v246_v59 = vadd.f32 1.0, %v644_v54 }
 0x120   :  { %v248_v56 = vadd.f32 1.0, %v646_v55  ;;  %v251_v2 = vmul.f32 %v247_v57, %v235_v61 }
 0x121   :  { %v648_v58 = vpop.eup %647  ;;  %v250_v4 = vmul.f32 %v246_v59, %v234_v0 }
 0x122   :  { %v249_v63 = vadd.f32 1.0, %v648_v58  ;;  %v252_v1 = vmul.f32 %v248_v56, %v236_v60 }
 0x124   :  { %v253_v3 = vmul.f32 %v249_v63, %v237_v62  ;;  %v256_v6 = vpack.c.bf16 %v252_v1, %v250_v4 }
 0x126   :  { %v257_v5 = vpack.c.bf16 %v253_v3, %v251_v2 }
 0x128   :  { %418 = vmatprep.mubr.bf16.mxu1 %v257_v5 }
 0x129   :  { %419 = vmatmul.mubr.bf16.vlgmr.msra.gmra.mxu1 %v256_v6 }
 0x1e9   :  { %v585_v7 = vpop.f32.mrf.mxu1 }
 0x1eb   :  { %v586_v9 = vpop.f32.mrf.mxu1 }
 0x1ec   :  { %v587_v11 = vadd.f32 %v586_v9, %v585_v7 }
 0x1ed   :  { %v588_v13 = vpop.f32.mrf.mxu1 }
 0x1ee   :  { %v447_v14 = vadd.f32 %v587_v11, %v553_v10 }
 0x1ef   :  { %v589_v15 = vpop.f32.mrf.mxu1 }
 0x1f0   :  { %v590_v16 = vadd.f32 %v589_v15, %v588_v13  ;;  %v449_v17 = vadd.f32 %v562_v12, %v447_v14 }
 0x1f2   :  { %v448_v19 = vadd.f32 %v590_v16, %v553_v10  ;;  %451 = vadd.xlane.f32.xlu0 %v449_v17 }
 0x1f4   :  { %v450_v20 = vadd.f32 %v563_v18, %v448_v19 }
 0x1f6   :  { %453 = vadd.xlane.f32.xlu0 %v450_v20 }
 0x27b   :  { %v452_v21 = vpop.xlane.xlu0 %451 }
 0x27c   :  { %v456_v22 = vmul.f32 0.0078125, %v452_v21 }
 0x27e   :  { %v458_v23 = vsub.f32 %v449_v17, %v456_v22 }
 0x27f   :  { %v454_v24 = vpop.xlane.xlu0 %453 }
 0x280   :  { %v457_v25 = vmul.f32 0.0078125, %v454_v24  ;;  %v460_v26 = vmul.f32 %v458_v23, %v458_v23 }
 0x282   :  { %v459_v27 = vsub.f32 %v450_v20, %v457_v25  ;;  %462 = vadd.xlane.f32.xlu1 %v460_v26 }
 0x284   :  { %v461_v28 = vmul.f32 %v459_v27, %v459_v27 }
 0x286   :  { %464 = vadd.xlane.f32.xlu1 %v461_v28 }
 0x30b   :  { %v463_v29 = vpop.xlane.xlu1 %462 }
 0x30c   :  { %v466_v30 = vmul.f32 0.0078125, %v463_v29 }
 0x30e   :  { %v468_v31 = vadd.f32 1e-05, %v466_v30 }
 0x30f   :  { %v465_v32 = vpop.xlane.xlu1 %464 }
 0x310   :  { %649 = vrsqrt.f32 %v468_v31  ;;  %v467_v33 = vmul.f32 0.0078125, %v465_v32 }
 0x312   :  { %v469_v34 = vadd.f32 1e-05, %v467_v33 }
 0x314   :  { %651 = vrsqrt.f32 %v469_v34 }
 0x31d   :  { %v650_v35 = vpop.eup %649 }
 0x31e   :  { %v472_v36 = vmul.f32 %v650_v35, %v458_v23 }
 0x320   :  { %v481_v40 = vmul.f32 %v554_v37, %v472_v36 }
 0x321   :  { %v652_v38 = vpop.eup %651 }
 0x322   :  { %v473_v39 = vmul.f32 %v652_v38, %v459_v27  ;;  %v490_v43 = vadd.f32 %v555_v41, %v481_v40 }
 0x324   :  { %v482_v42 = vmul.f32 %v554_v37, %v473_v39 }
 0x326   :  { %v491_v44 = vadd.f32 %v555_v41, %v482_v42 }
 0x328   :  { %v567_v45 = vpack.c.bf16 %v491_v44, %v490_v43 }
 0x32a   :  { %568 = vst [vmem:[#allocation9] sm:$0xff] %v567_v45  }
 0x32b   :  { %724 = shalt.err (!%p721_p5)
}
 0x32c   :  { %513 = dma.vmem_to_hbm [thread:$0]  %s508_s24, 128, %s828_s7, [#allocation5], %s743_s11, %s743_s11, %s744_s12  }
 0x32d   :  { %737 = dma.done.wait [#allocation5], 128  }
 0x32e   :  { %738 = vsyncadd [#allocation5], 4294967168 }
 0x32f   :  { %517 = vsyncpa [#allocation4], 1 }
 0x330   :  { %518 = vsyncpa [#allocation7], 1 }
 0x331   :  { %519 = vsyncpa [#allocation5], 1 }

</bundles_post_ra>
